<compile_context>
chip_gen: v7x
topology: tpu7x:2x2x1
jax: 0.10.0
libtpu: 0.0.40
codegen_flags: <defaults>
</compile_context>

<pallas_src>
import jax
import jax.numpy as jnp
from jax.experimental import pallas as pl
from jax.experimental.pallas import tpu as pltpu  # noqa: F401  (kept for TPU-specific params if scaled up)

# ---------------- model hyper-parameters (small, consistent with the module) ----------------
B = 2           # batch
T = 8           # sequence length (== block_size)
N_EMBED = 32    # n_embed
N_HEAD = 4      # n_head
HEAD_SIZE = N_EMBED // N_HEAD
HIDDEN = 4 * N_EMBED
LN_EPS = 1e-5
NEG_BIG = -1e30  # finite "-inf" for the causal mask (diagonal is always unmasked)


def _layernorm(h, gamma, beta):
    # gamma/beta: (1, C); h: (rows, C)
    mu = jnp.mean(h, axis=-1, keepdims=True)
    var = jnp.mean((h - mu) ** 2, axis=-1, keepdims=True)
    return (h - mu) * jax.lax.rsqrt(var + LN_EPS) * gamma + beta


def _gelu_exact(x):
    # PyTorch nn.GELU() default: exact erf formulation.
    return 0.5 * x * (1.0 + jax.lax.erf(x * jnp.float32(0.7071067811865476)))


def block_kernel(x_ref,
                 ln1g_ref, ln1b_ref,
                 wq_ref, wk_ref, wv_ref,      # (H, C, D); 1/sqrt(D) already folded into wq
                 wp_ref, bp_ref,              # (H, D, C), (1, C)
                 ln2g_ref, ln2b_ref,
                 w1_ref, b1_ref, w2_ref, b2_ref,
                 o_ref):
    BT = B * T
    x = x_ref[...]                                              # (BT, C)

    # ---- x + sa(ln1(x)) ----
    h1 = _layernorm(x, ln1g_ref[...], ln1b_ref[...])            # (BT, C)

    # Head-batched projections: (H, BT, C) @ (H, C, D) -> (H, BT, D)
    hb = jnp.broadcast_to(h1, (N_HEAD, BT, N_EMBED))
    q = jnp.einsum('hbc,hcd->hbd', hb, wq_ref[...], preferred_element_type=jnp.float32)
    k = jnp.einsum('hbc,hcd->hbd', hb, wk_ref[...], preferred_element_type=jnp.float32)
    v = jnp.einsum('hbc,hcd->hbd', hb, wv_ref[...], preferred_element_type=jnp.float32)

    row = jax.lax.broadcasted_iota(jnp.int32, (T, T), 0)
    col = jax.lax.broadcasted_iota(jnp.int32, (T, T), 1)
    causal = (col <= row)[None]                                 # (1, T, T)

    sa_parts = []
    for b in range(B):                                          # B=2, fully unrolled
        sl = slice(b * T, (b + 1) * T)
        qb, kb, vb = q[:, sl, :], k[:, sl, :], v[:, sl, :]      # (H, T, D)

        s = jnp.einsum('htd,hsd->hts', qb, kb,
                       preferred_element_type=jnp.float32)      # (H, T, T), scale pre-folded
        s = jnp.where(causal, s, jnp.float32(NEG_BIG))
        s = s - jnp.max(s, axis=-1, keepdims=True)
        p = jnp.exp(s)
        inv = pl.reciprocal(jnp.sum(p, axis=-1, keepdims=True), approx=True)
        p = p * inv

        att = jnp.einsum('hts,hsd->htd', p, vb,
                         preferred_element_type=jnp.float32)    # (H, T, D)
        # Per-head slice of the output projection, reduced over heads:
        # replaces concat(head_outs) @ Wp without any lane-concat.
        projh = jnp.einsum('htd,hdc->htc', att, wp_ref[...],
                           preferred_element_type=jnp.float32)  # (H, T, C)
        sa_parts.append(jnp.sum(projh, axis=0))                 # (T, C)

    sa = jnp.concatenate(sa_parts, axis=0) + bp_ref[...]        # (BT, C)
    x1 = x + sa

    # ---- x + ffwd(ln2(x)) ----
    h2 = _layernorm(x1, ln2g_ref[...], ln2b_ref[...])
    ff = jnp.dot(h2, w1_ref[...], preferred_element_type=jnp.float32) + b1_ref[...]
    ff = _gelu_exact(ff)
    ff = jnp.dot(ff, w2_ref[...], preferred_element_type=jnp.float32) + b2_ref[...]

    o_ref[...] = x1 + ff                                        # (BT, C)


def block_forward(x, params):
    """x: (B, T, C) float32.  params: dict of weights (see init_params)."""
    C, H, D = N_EMBED, N_HEAD, HEAD_SIZE
    scale = jnp.float32(D ** -0.5)

    # Host-side weight re-layout (free, done in XLA outside the kernel):
    #   per-head QKV weights (H, C, D), per-head proj weights (H, D, C),
    #   attention scale folded into Wq.
    wq_h = (params["wq"] * scale).reshape(C, H, D).transpose(1, 0, 2)
    wk_h = params["wk"].reshape(C, H, D).transpose(1, 0, 2)
    wv_h = params["wv"].reshape(C, H, D).transpose(1, 0, 2)
    wp_h = params["wp"].reshape(H, D, C)

    x2d = x.reshape(B * T, C)

    out2d = pl.pallas_call(
        block_kernel,
        out_shape=jax.ShapeDtypeStruct((B * T, C), jnp.float32),
    )(x2d,
      params["ln1_g"], params["ln1_b"],
      wq_h, wk_h, wv_h,
      wp_h, params["bp"],
      params["ln2_g"], params["ln2_b"],
      params["w1"], params["b1"], params["w2"], params["b2"])

    return out2d.reshape(B, T, C)


# ---------------- pure-JAX reference (mirrors the PyTorch forward exactly) ----------------
def block_reference(x, p):
    def ln(h, g, b):
        mu = jnp.mean(h, axis=-1, keepdims=True)
        var = jnp.mean((h - mu) ** 2, axis=-1, keepdims=True)
        return (h - mu) / jnp.sqrt(var + LN_EPS) * g + b

    h = ln(x, p["ln1_g"], p["ln1_b"])                        # (B, T, C)
    q = h @ p["wq"]
    k = h @ p["wk"]
    v = h @ p["wv"]
    outs = []
    tril = jnp.tril(jnp.ones((T, T), jnp.float32))
    for hh in range(N_HEAD):
        sl = slice(hh * HEAD_SIZE, (hh + 1) * HEAD_SIZE)
        qh, kh, vh = q[..., sl], k[..., sl], v[..., sl]
        wei = jnp.einsum("btd,bsd->bts", qh, kh) * (HEAD_SIZE ** -0.5)
        wei = jnp.where(tril == 0, -jnp.inf, wei)
        wei = jax.nn.softmax(wei, axis=-1)
        outs.append(jnp.einsum("bts,bsd->btd", wei, vh))
    att = jnp.concatenate(outs, axis=-1)
    sa = att @ p["wp"] + p["bp"]
    x1 = x + sa
    h2 = ln(x1, p["ln2_g"], p["ln2_b"])
    ff = h2 @ p["w1"] + p["b1"]
    ff = jax.nn.gelu(ff, approximate=False)
    ff = ff @ p["w2"] + p["b2"]
    return x1 + ff


def init_params(key):
    ks = jax.random.split(key, 8)
    C = N_EMBED
    scale = 0.02
    return {
        "ln1_g": jnp.ones((1, C), jnp.float32),
        "ln1_b": jnp.zeros((1, C), jnp.float32),
        "wq": scale * jax.random.normal(ks[0], (C, C), jnp.float32),
        "wk": scale * jax.random.normal(ks[1], (C, C), jnp.float32),
        "wv": scale * jax.random.normal(ks[2], (C, C), jnp.float32),
        "wp": scale * jax.random.normal(ks[3], (C, C), jnp.float32),
        "bp": scale * jax.random.normal(ks[4], (1, C), jnp.float32),
        "ln2_g": jnp.ones((1, C), jnp.float32),
        "ln2_b": jnp.zeros((1, C), jnp.float32),
        "w1": scale * jax.random.normal(ks[5], (C, HIDDEN), jnp.float32),
        "b1": jnp.zeros((1, HIDDEN), jnp.float32),
        "w2": scale * jax.random.normal(ks[6], (HIDDEN, C), jnp.float32),
        "b2": jnp.zeros((1, C), jnp.float32),
    }


if __name__ == "__main__":
    key = jax.random.PRNGKey(0)
    k_x, k_p = jax.random.split(key)
    x = jax.random.normal(k_x, (B, T, N_EMBED), jnp.float32)
    params = init_params(k_p)

    out = jax.block_until_ready(block_forward(x, params))
    ref = block_reference(x, params)

    assert out.shape == (B, T, N_EMBED)
    max_err = float(jnp.max(jnp.abs(out - ref)))
    # slightly relaxed vs 1e-4 to absorb the approx-EUP reciprocal in the softmax
    assert max_err < 2e-4, max_err

    print("KERNEL_OK")
</pallas_src>

<mosaic_0001>
module attributes {stable_mosaic.version = 11 : i64} {
  func.func @block_kernel(%arg0: memref<16x32xf32, #tpu.memory_space<vmem>>, %arg1: memref<1x32xf32, #tpu.memory_space<vmem>>, %arg2: memref<1x32xf32, #tpu.memory_space<vmem>>, %arg3: memref<4x32x8xf32, #tpu.memory_space<vmem>>, %arg4: memref<4x32x8xf32, #tpu.memory_space<vmem>>, %arg5: memref<4x32x8xf32, #tpu.memory_space<vmem>>, %arg6: memref<4x8x32xf32, #tpu.memory_space<vmem>>, %arg7: memref<1x32xf32, #tpu.memory_space<vmem>>, %arg8: memref<1x32xf32, #tpu.memory_space<vmem>>, %arg9: memref<1x32xf32, #tpu.memory_space<vmem>>, %arg10: memref<32x128xf32, #tpu.memory_space<vmem>>, %arg11: memref<1x128xf32, #tpu.memory_space<vmem>>, %arg12: memref<128x32xf32, #tpu.memory_space<vmem>>, %arg13: memref<1x32xf32, #tpu.memory_space<vmem>>, %arg14: memref<16x32xf32, #tpu.memory_space<vmem>>) attributes {dimension_semantics = [], scalar_prefetch = 0 : i64, scratch_operands = 0 : i64, tpu.core_type = #tpu.core_type<tc>} {
    %c0 = arith.constant 0 : index
    %c0_0 = arith.constant 0 : index
    %0 = vector.load %arg0[%c0, %c0_0] : memref<16x32xf32, #tpu.memory_space<vmem>>, vector<16x32xf32>
    %c0_1 = arith.constant 0 : index
    %c0_2 = arith.constant 0 : index
    %1 = vector.load %arg1[%c0_1, %c0_2] : memref<1x32xf32, #tpu.memory_space<vmem>>, vector<1x32xf32>
    %c0_3 = arith.constant 0 : index
    %c0_4 = arith.constant 0 : index
    %2 = vector.load %arg2[%c0_3, %c0_4] : memref<1x32xf32, #tpu.memory_space<vmem>>, vector<1x32xf32>
    %cst = arith.constant dense<0.000000e+00> : vector<16xf32>
    %3 = vector.multi_reduction <add>, %0, %cst [1] : vector<16x32xf32> to vector<16xf32>
    %4 = vector.shape_cast %3 : vector<16xf32> to vector<16x1xf32>
    %cst_5 = arith.constant 3.200000e+01 : f32
    %5 = vector.broadcast %cst_5 : f32 to vector<16x1xf32>
    %6 = arith.divf %4, %5 : vector<16x1xf32>
    %7 = vector.broadcast %6 : vector<16x1xf32> to vector<16x32xf32>
    %8 = arith.subf %0, %7 : vector<16x32xf32>
    %9 = arith.mulf %8, %8 : vector<16x32xf32>
    %cst_6 = arith.constant dense<0.000000e+00> : vector<16xf32>
    %10 = vector.multi_reduction <add>, %9, %cst_6 [1] : vector<16x32xf32> to vector<16xf32>
    %11 = vector.shape_cast %10 : vector<16xf32> to vector<16x1xf32>
    %cst_7 = arith.constant 3.200000e+01 : f32
    %12 = vector.broadcast %cst_7 : f32 to vector<16x1xf32>
    %13 = arith.divf %11, %12 : vector<16x1xf32>
    %14 = vector.broadcast %6 : vector<16x1xf32> to vector<16x32xf32>
    %15 = arith.subf %0, %14 : vector<16x32xf32>
    %cst_8 = arith.constant 9.99999974E-6 : f32
    %16 = vector.broadcast %cst_8 : f32 to vector<16x1xf32>
    %17 = arith.addf %13, %16 : vector<16x1xf32>
    %18 = math.rsqrt %17 : vector<16x1xf32>
    %19 = vector.broadcast %18 : vector<16x1xf32> to vector<16x32xf32>
    %20 = arith.mulf %15, %19 : vector<16x32xf32>
    %21 = vector.broadcast %1 : vector<1x32xf32> to vector<16x32xf32>
    %22 = arith.mulf %20, %21 : vector<16x32xf32>
    %23 = vector.broadcast %2 : vector<1x32xf32> to vector<16x32xf32>
    %24 = arith.addf %22, %23 : vector<16x32xf32>
    %25 = vector.shape_cast %24 : vector<16x32xf32> to vector<1x16x32xf32>
    %26 = vector.broadcast %25 : vector<1x16x32xf32> to vector<4x16x32xf32>
    %c0_9 = arith.constant 0 : index
    %c0_10 = arith.constant 0 : index
    %c0_11 = arith.constant 0 : index
    %27 = vector.load %arg3[%c0_9, %c0_10, %c0_11] : memref<4x32x8xf32, #tpu.memory_space<vmem>>, vector<4x32x8xf32>
    "tpu.trace_start"() <{level = 10 : i32, message = "hbc,hcd->hbd"}> : () -> ()
    %cst_12 = arith.constant dense<0.000000e+00> : vector<4x16x8xf32>
    %28 = tpu.matmul %26, %27, %cst_12 {dimension_numbers = #tpu.dot_dimension_numbers<[2], [1], [1], [2], [0, 0, 0, 1, 1, 2], [0], [0]>} : vector<4x16x32xf32>, vector<4x32x8xf32>, vector<4x16x8xf32> -> vector<4x16x8xf32>
    "tpu.trace_stop"() : () -> ()
    %c0_13 = arith.constant 0 : index
    %c0_14 = arith.constant 0 : index
    %c0_15 = arith.constant 0 : index
    %29 = vector.load %arg4[%c0_13, %c0_14, %c0_15] : memref<4x32x8xf32, #tpu.memory_space<vmem>>, vector<4x32x8xf32>
    "tpu.trace_start"() <{level = 10 : i32, message = "hbc,hcd->hbd"}> : () -> ()
    %cst_16 = arith.constant dense<0.000000e+00> : vector<4x16x8xf32>
    %30 = tpu.matmul %26, %29, %cst_16 {dimension_numbers = #tpu.dot_dimension_numbers<[2], [1], [1], [2], [0, 0, 0, 1, 1, 2], [0], [0]>} : vector<4x16x32xf32>, vector<4x32x8xf32>, vector<4x16x8xf32> -> vector<4x16x8xf32>
    "tpu.trace_stop"() : () -> ()
    %c0_17 = arith.constant 0 : index
    %c0_18 = arith.constant 0 : index
    %c0_19 = arith.constant 0 : index
    %31 = vector.load %arg5[%c0_17, %c0_18, %c0_19] : memref<4x32x8xf32, #tpu.memory_space<vmem>>, vector<4x32x8xf32>
    "tpu.trace_start"() <{level = 10 : i32, message = "hbc,hcd->hbd"}> : () -> ()
    %cst_20 = arith.constant dense<0.000000e+00> : vector<4x16x8xf32>
    %32 = tpu.matmul %26, %31, %cst_20 {dimension_numbers = #tpu.dot_dimension_numbers<[2], [1], [1], [2], [0, 0, 0, 1, 1, 2], [0], [0]>} : vector<4x16x32xf32>, vector<4x32x8xf32>, vector<4x16x8xf32> -> vector<4x16x8xf32>
    "tpu.trace_stop"() : () -> ()
    %33 = tpu.iota {dimensions = array<i32: 0>} : vector<8x8xi32>
    %34 = tpu.iota {dimensions = array<i32: 1>} : vector<8x8xi32>
    %35 = arith.cmpi sle, %34, %33 : vector<8x8xi32>
    %36 = vector.shape_cast %35 : vector<8x8xi1> to vector<1x8x8xi1>
    %37 = vector.extract_strided_slice %28 {offsets = [0, 0, 0], sizes = [4, 8, 8], strides = [1, 1, 1]} : vector<4x16x8xf32> to vector<4x8x8xf32>
    %38 = vector.extract_strided_slice %30 {offsets = [0, 0, 0], sizes = [4, 8, 8], strides = [1, 1, 1]} : vector<4x16x8xf32> to vector<4x8x8xf32>
    %39 = vector.extract_strided_slice %32 {offsets = [0, 0, 0], sizes = [4, 8, 8], strides = [1, 1, 1]} : vector<4x16x8xf32> to vector<4x8x8xf32>
    "tpu.trace_start"() <{level = 10 : i32, message = "htd,hsd->hts"}> : () -> ()
    %cst_21 = arith.constant dense<0.000000e+00> : vector<4x8x8xf32>
    %40 = tpu.matmul %37, %38, %cst_21 {dimension_numbers = #tpu.dot_dimension_numbers<[2], [2], [1], [1], [0, 0, 0, 1, 1, 1], [0], [0]>} : vector<4x8x8xf32>, vector<4x8x8xf32>, vector<4x8x8xf32> -> vector<4x8x8xf32>
    %cst_22 = arith.constant -1.000000e+30 : f32
    "tpu.trace_stop"() : () -> ()
    %41 = vector.shape_cast %36 : vector<1x8x8xi1> to vector<1x8x8xi1>
    %42 = vector.broadcast %41 : vector<1x8x8xi1> to vector<4x8x8xi1>
    %43 = vector.broadcast %cst_22 : f32 to vector<4x8x8xf32>
    %44 = arith.select %42, %40, %43 : vector<4x8x8xi1>, vector<4x8x8xf32>
    %cst_23 = arith.constant dense<0xFF800000> : vector<4x8xf32>
    %45 = vector.multi_reduction <maximumf>, %44, %cst_23 [2] : vector<4x8x8xf32> to vector<4x8xf32>
    %46 = vector.shape_cast %45 : vector<4x8xf32> to vector<4x8x1xf32>
    %47 = vector.broadcast %46 : vector<4x8x1xf32> to vector<4x8x8xf32>
    %48 = arith.subf %44, %47 : vector<4x8x8xf32>
    %49 = math.exp %48 : vector<4x8x8xf32>
    %cst_24 = arith.constant dense<0.000000e+00> : vector<4x8xf32>
    %50 = vector.multi_reduction <add>, %49, %cst_24 [2] : vector<4x8x8xf32> to vector<4x8xf32>
    %51 = vector.shape_cast %50 : vector<4x8xf32> to vector<4x8x1xf32>
    %52 = tpu.reciprocal %51 {approx = true} : vector<4x8x1xf32> -> vector<4x8x1xf32>
    %53 = vector.broadcast %52 : vector<4x8x1xf32> to vector<4x8x8xf32>
    %54 = arith.mulf %49, %53 : vector<4x8x8xf32>
    "tpu.trace_start"() <{level = 10 : i32, message = "hts,hsd->htd"}> : () -> ()
    %cst_25 = arith.constant dense<0.000000e+00> : vector<4x8x8xf32>
    %55 = tpu.matmul %54, %39, %cst_25 {dimension_numbers = #tpu.dot_dimension_numbers<[2], [1], [1], [2], [0, 0, 0, 1, 1, 2], [0], [0]>} : vector<4x8x8xf32>, vector<4x8x8xf32>, vector<4x8x8xf32> -> vector<4x8x8xf32>
    "tpu.trace_stop"() : () -> ()
    %c0_26 = arith.constant 0 : index
    %c0_27 = arith.constant 0 : index
    %c0_28 = arith.constant 0 : index
    %56 = vector.load %arg6[%c0_26, %c0_27, %c0_28] : memref<4x8x32xf32, #tpu.memory_space<vmem>>, vector<4x8x32xf32>
    "tpu.trace_start"() <{level = 10 : i32, message = "htd,hdc->htc"}> : () -> ()
    %cst_29 = arith.constant dense<0.000000e+00> : vector<4x8x32xf32>
    %57 = tpu.matmul %55, %56, %cst_29 {dimension_numbers = #tpu.dot_dimension_numbers<[2], [1], [1], [2], [0, 0, 0, 1, 1, 2], [0], [0]>} : vector<4x8x8xf32>, vector<4x8x32xf32>, vector<4x8x32xf32> -> vector<4x8x32xf32>
    "tpu.trace_stop"() : () -> ()
    %cst_30 = arith.constant dense<0.000000e+00> : vector<8x32xf32>
    %58 = vector.multi_reduction <add>, %57, %cst_30 [0] : vector<4x8x32xf32> to vector<8x32xf32>
    %59 = vector.extract_strided_slice %28 {offsets = [0, 8, 0], sizes = [4, 8, 8], strides = [1, 1, 1]} : vector<4x16x8xf32> to vector<4x8x8xf32>
    %60 = vector.extract_strided_slice %30 {offsets = [0, 8, 0], sizes = [4, 8, 8], strides = [1, 1, 1]} : vector<4x16x8xf32> to vector<4x8x8xf32>
    %61 = vector.extract_strided_slice %32 {offsets = [0, 8, 0], sizes = [4, 8, 8], strides = [1, 1, 1]} : vector<4x16x8xf32> to vector<4x8x8xf32>
    "tpu.trace_start"() <{level = 10 : i32, message = "htd,hsd->hts"}> : () -> ()
    %cst_31 = arith.constant dense<0.000000e+00> : vector<4x8x8xf32>
    %62 = tpu.matmul %59, %60, %cst_31 {dimension_numbers = #tpu.dot_dimension_numbers<[2], [2], [1], [1], [0, 0, 0, 1, 1, 1], [0], [0]>} : vector<4x8x8xf32>, vector<4x8x8xf32>, vector<4x8x8xf32> -> vector<4x8x8xf32>
    %cst_32 = arith.constant -1.000000e+30 : f32
    "tpu.trace_stop"() : () -> ()
    %63 = vector.shape_cast %36 : vector<1x8x8xi1> to vector<1x8x8xi1>
    %64 = vector.broadcast %63 : vector<1x8x8xi1> to vector<4x8x8xi1>
    %65 = vector.broadcast %cst_32 : f32 to vector<4x8x8xf32>
    %66 = arith.select %64, %62, %65 : vector<4x8x8xi1>, vector<4x8x8xf32>
    %cst_33 = arith.constant dense<0xFF800000> : vector<4x8xf32>
    %67 = vector.multi_reduction <maximumf>, %66, %cst_33 [2] : vector<4x8x8xf32> to vector<4x8xf32>
    %68 = vector.shape_cast %67 : vector<4x8xf32> to vector<4x8x1xf32>
    %69 = vector.broadcast %68 : vector<4x8x1xf32> to vector<4x8x8xf32>
    %70 = arith.subf %66, %69 : vector<4x8x8xf32>
    %71 = math.exp %70 : vector<4x8x8xf32>
    %cst_34 = arith.constant dense<0.000000e+00> : vector<4x8xf32>
    %72 = vector.multi_reduction <add>, %71, %cst_34 [2] : vector<4x8x8xf32> to vector<4x8xf32>
    %73 = vector.shape_cast %72 : vector<4x8xf32> to vector<4x8x1xf32>
    %74 = tpu.reciprocal %73 {approx = true} : vector<4x8x1xf32> -> vector<4x8x1xf32>
    %75 = vector.broadcast %74 : vector<4x8x1xf32> to vector<4x8x8xf32>
    %76 = arith.mulf %71, %75 : vector<4x8x8xf32>
    "tpu.trace_start"() <{level = 10 : i32, message = "hts,hsd->htd"}> : () -> ()
    %cst_35 = arith.constant dense<0.000000e+00> : vector<4x8x8xf32>
    %77 = tpu.matmul %76, %61, %cst_35 {dimension_numbers = #tpu.dot_dimension_numbers<[2], [1], [1], [2], [0, 0, 0, 1, 1, 2], [0], [0]>} : vector<4x8x8xf32>, vector<4x8x8xf32>, vector<4x8x8xf32> -> vector<4x8x8xf32>
    "tpu.trace_stop"() : () -> ()
    %c0_36 = arith.constant 0 : index
    %c0_37 = arith.constant 0 : index
    %c0_38 = arith.constant 0 : index
    %78 = vector.load %arg6[%c0_36, %c0_37, %c0_38] : memref<4x8x32xf32, #tpu.memory_space<vmem>>, vector<4x8x32xf32>
    "tpu.trace_start"() <{level = 10 : i32, message = "htd,hdc->htc"}> : () -> ()
    %cst_39 = arith.constant dense<0.000000e+00> : vector<4x8x32xf32>
    %79 = tpu.matmul %77, %78, %cst_39 {dimension_numbers = #tpu.dot_dimension_numbers<[2], [1], [1], [2], [0, 0, 0, 1, 1, 2], [0], [0]>} : vector<4x8x8xf32>, vector<4x8x32xf32>, vector<4x8x32xf32> -> vector<4x8x32xf32>
    "tpu.trace_stop"() : () -> ()
    %cst_40 = arith.constant dense<0.000000e+00> : vector<8x32xf32>
    %80 = vector.multi_reduction <add>, %79, %cst_40 [0] : vector<4x8x32xf32> to vector<8x32xf32>
    %81 = tpu.concatenate %58, %80 in 0 : vector<8x32xf32>, vector<8x32xf32> -> vector<16x32xf32>
    %c0_41 = arith.constant 0 : index
    %c0_42 = arith.constant 0 : index
    %82 = vector.load %arg7[%c0_41, %c0_42] : memref<1x32xf32, #tpu.memory_space<vmem>>, vector<1x32xf32>
    %83 = vector.broadcast %82 : vector<1x32xf32> to vector<16x32xf32>
    %84 = arith.addf %81, %83 : vector<16x32xf32>
    %85 = arith.addf %0, %84 : vector<16x32xf32>
    %c0_43 = arith.constant 0 : index
    %c0_44 = arith.constant 0 : index
    %86 = vector.load %arg8[%c0_43, %c0_44] : memref<1x32xf32, #tpu.memory_space<vmem>>, vector<1x32xf32>
    %c0_45 = arith.constant 0 : index
    %c0_46 = arith.constant 0 : index
    %87 = vector.load %arg9[%c0_45, %c0_46] : memref<1x32xf32, #tpu.memory_space<vmem>>, vector<1x32xf32>
    %cst_47 = arith.constant dense<0.000000e+00> : vector<16xf32>
    %88 = vector.multi_reduction <add>, %85, %cst_47 [1] : vector<16x32xf32> to vector<16xf32>
    %89 = vector.shape_cast %88 : vector<16xf32> to vector<16x1xf32>
    %cst_48 = arith.constant 3.200000e+01 : f32
    %90 = vector.broadcast %cst_48 : f32 to vector<16x1xf32>
    %91 = arith.divf %89, %90 : vector<16x1xf32>
    %92 = vector.broadcast %91 : vector<16x1xf32> to vector<16x32xf32>
    %93 = arith.subf %85, %92 : vector<16x32xf32>
    %94 = arith.mulf %93, %93 : vector<16x32xf32>
    %cst_49 = arith.constant dense<0.000000e+00> : vector<16xf32>
    %95 = vector.multi_reduction <add>, %94, %cst_49 [1] : vector<16x32xf32> to vector<16xf32>
    %96 = vector.shape_cast %95 : vector<16xf32> to vector<16x1xf32>
    %cst_50 = arith.constant 3.200000e+01 : f32
    %97 = vector.broadcast %cst_50 : f32 to vector<16x1xf32>
    %98 = arith.divf %96, %97 : vector<16x1xf32>
    %99 = vector.broadcast %91 : vector<16x1xf32> to vector<16x32xf32>
    %100 = arith.subf %85, %99 : vector<16x32xf32>
    %cst_51 = arith.constant 9.99999974E-6 : f32
    %101 = vector.broadcast %cst_51 : f32 to vector<16x1xf32>
    %102 = arith.addf %98, %101 : vector<16x1xf32>
    %103 = math.rsqrt %102 : vector<16x1xf32>
    %104 = vector.broadcast %103 : vector<16x1xf32> to vector<16x32xf32>
    %105 = arith.mulf %100, %104 : vector<16x32xf32>
    %106 = vector.broadcast %86 : vector<1x32xf32> to vector<16x32xf32>
    %107 = arith.mulf %105, %106 : vector<16x32xf32>
    %108 = vector.broadcast %87 : vector<1x32xf32> to vector<16x32xf32>
    %109 = arith.addf %107, %108 : vector<16x32xf32>
    %c0_52 = arith.constant 0 : index
    %c0_53 = arith.constant 0 : index
    %110 = vector.load %arg10[%c0_52, %c0_53] : memref<32x128xf32, #tpu.memory_space<vmem>>, vector<32x128xf32>
    %cst_54 = arith.constant dense<0.000000e+00> : vector<16x128xf32>
    %111 = tpu.matmul %109, %110, %cst_54 {dimension_numbers = #tpu.dot_dimension_numbers<[1], [0], [0], [1], [0, 0, 1, 1], [], []>} : vector<16x32xf32>, vector<32x128xf32>, vector<16x128xf32> -> vector<16x128xf32>
    %c0_55 = arith.constant 0 : index
    %c0_56 = arith.constant 0 : index
    %112 = vector.load %arg11[%c0_55, %c0_56] : memref<1x128xf32, #tpu.memory_space<vmem>>, vector<1x128xf32>
    %113 = vector.broadcast %112 : vector<1x128xf32> to vector<16x128xf32>
    %114 = arith.addf %111, %113 : vector<16x128xf32>
    %cst_57 = arith.constant 5.000000e-01 : f32
    %115 = vector.broadcast %cst_57 : f32 to vector<16x128xf32>
    %116 = arith.mulf %115, %114 : vector<16x128xf32>
    %cst_58 = arith.constant 0.707106769 : f32
    %117 = vector.broadcast %cst_58 : f32 to vector<16x128xf32>
    %118 = arith.mulf %114, %117 : vector<16x128xf32>
    %119 = math.erf %118 : vector<16x128xf32>
    %cst_59 = arith.constant 1.000000e+00 : f32
    %120 = vector.broadcast %cst_59 : f32 to vector<16x128xf32>
    %121 = arith.addf %120, %119 : vector<16x128xf32>
    %122 = arith.mulf %116, %121 : vector<16x128xf32>
    %c0_60 = arith.constant 0 : index
    %c0_61 = arith.constant 0 : index
    %123 = vector.load %arg12[%c0_60, %c0_61] : memref<128x32xf32, #tpu.memory_space<vmem>>, vector<128x32xf32>
    %cst_62 = arith.constant dense<0.000000e+00> : vector<16x32xf32>
    %124 = tpu.matmul %122, %123, %cst_62 {dimension_numbers = #tpu.dot_dimension_numbers<[1], [0], [0], [1], [0, 0, 1, 1], [], []>} : vector<16x128xf32>, vector<128x32xf32>, vector<16x32xf32> -> vector<16x32xf32>
    %c0_63 = arith.constant 0 : index
    %c0_64 = arith.constant 0 : index
    %125 = vector.load %arg13[%c0_63, %c0_64] : memref<1x32xf32, #tpu.memory_space<vmem>>, vector<1x32xf32>
    %126 = vector.broadcast %125 : vector<1x32xf32> to vector<16x32xf32>
    %127 = arith.addf %124, %126 : vector<16x32xf32>
    %128 = arith.addf %85, %127 : vector<16x32xf32>
    %c0_65 = arith.constant 0 : index
    %c0_66 = arith.constant 0 : index
    %129 = vector.load %arg14[%c0_65, %c0_66] : memref<16x32xf32, #tpu.memory_space<vmem>>, vector<16x32xf32>
    tpu.vector_store %arg14[%c0_65, %c0_66], %128 {strides = array<i32>} : memref<16x32xf32, #tpu.memory_space<vmem>>, vector<16x32xf32>,
    return
  }
}

</mosaic_0001>

<bundles_post_ra>
// kernel: tpu_custom_call.1
= control target key start
LH: loop header
LB: loop body
LE: loop exit
PB: predicated region body
PF: predicated region fallthrough
CT: control target
= control target key end

     0   :  { %vm52_vm0 = vcmask 261120   ;;  %s4580_s0 = inlined_call_operand.vmem [shape: f32[16,32], index: 0, kind: input, shape index: {}]   ;;  %s4581_s1 = inlined_call_operand.vmem [shape: f32[1,32], index: 1, kind: input, shape index: {}]   ;;  %s4582_s2 = inlined_call_operand.vmem [shape: f32[1,32], index: 2, kind: input, shape index: {}]   ;;  %s4583_s3 = inlined_call_operand.vmem [shape: f32[4,32,8], index: 3, kind: input, shape index: {}]   ;;  %s4584_s4 = inlined_call_operand.vmem [shape: f32[4,32,8], index: 4, kind: input, shape index: {}]   ;;  %s4585_s5 = inlined_call_operand.vmem [shape: f32[4,32,8], index: 5, kind: input, shape index: {}]   ;;  %s4586_s6 = inlined_call_operand.vmem [shape: f32[4,8,32], index: 6, kind: input, shape index: {}]   ;;  %s4587_s7 = inlined_call_operand.vmem [shape: f32[1,32], index: 7, kind: input, shape index: {}]   ;;  %s4588_s8 = inlined_call_operand.vmem [shape: f32[1,32], index: 8, kind: input, shape index: {}]   ;;  %s4589_s9 = inlined_call_operand.vmem [shape: f32[1,32], index: 9, kind: input, shape index: {}]   ;;  %s4590_s10 = inlined_call_operand.vmem [shape: f32[32,128], index: 10, kind: input, shape index: {}]   ;;  %s4591_s11 = inlined_call_operand.vmem [shape: f32[1,128], index: 11, kind: input, shape index: {}]   ;;  %s4592_s12 = inlined_call_operand.vmem [shape: f32[128,32], index: 12, kind: input, shape index: {}]   ;;  %s4593_s13 = inlined_call_operand.vmem [shape: f32[1,32], index: 13, kind: input, shape index: {}]   ;;  %s4594_s14 = inlined_call_operand.hbm [shape: f32[16,32], index: 14, kind: output, shape index: {}]  }
   0x1   :  { %v4026_v0 = vld [vmem:[%s4580_s0] sm:$0xff]  ;;  %v4031_v1 = vld [vmem:[%s4580_s0 + $0x8] sm:$0xff] }
   0x2   :  { %19 = vsyncpa [#allocation3], 0  ;;  %v53_v2 = vsel %vm52_vm0, %v4026_v0, 0.0  ;;  %v56_v3 = vsel %vm52_vm0, %v4031_v1, 0.0  ;;  %v96_v14 = vld [vmem:[%s4583_s3] sm:$0xff]  ;;  %v97_v15 = vld [vmem:[%s4583_s3 + $0x8] sm:$0xff] }
   0x3   :  { %54 = vadd.xlane.f32.xlu0 %v53_v2  ;;  %v108_v16 = vld [vmem:[%s4583_s3 + $0x60] sm:$0xff]  ;;  %v3734_v17 = vpack.c.bf16 %v97_v15, %v96_v14  ;;  %v109_v18 = vld [vmem:[%s4583_s3 + $0x68] sm:$0xff]  ;;  %v98_v20 = vld [vmem:[%s4583_s3 + $0x10] sm:$0xff]  ;;  %vm3944_vm1 = vmmov 0   ;;  %vm1055_vm2 = vcmask 64512   ;;  %s3945_s21 = smov [#allocation2]  }
   0x4   :  { %v3758_v19 = vpack.c.bf16 %v109_v18, %v108_v16  ;;  %v99_v21 = vld [vmem:[%s4583_s3 + $0x18] sm:$0xff]  ;;  %v110_v22 = vld [vmem:[%s4583_s3 + $0x70] sm:$0xff]  ;;  %v100_v26 = vld [vmem:[%s4583_s3 + $0x20] sm:$0xff] }
   0x5   :  { %3735 = vmatprep.subr.bf16.mxu0 %v3734_v17  ;;  %v3738_v23 = vpack.c.bf16 %v99_v21, %v98_v20  ;;  %v111_v24 = vld [vmem:[%s4583_s3 + $0x78] sm:$0xff]  ;;  %v101_v27 = vld [vmem:[%s4583_s3 + $0x28] sm:$0xff]  ;;  %v422_v28 = vld [vmem:[%s4584_s4 + $0x20] sm:$0xff] }
   0x6   :  { %3759 = vmatprep.subr.bf16.mxu1 %v3758_v19  ;;  %3737 = vmatpush3.bf16.msra.mxu0 %v3734_v17  ;;  %v3762_v25 = vpack.c.bf16 %v111_v24, %v110_v22  ;;  %v3742_v29 = vpack.c.bf16 %v101_v27, %v100_v26  ;;  %v423_v30 = vld [vmem:[%s4584_s4 + $0x28] sm:$0xff]  ;;  %v3227_v39 = vld [vmem:[%s4581_s1] ss:$0 sm:$0xff]  ;;  %v102_v46 = vld [vmem:[%s4583_s3 + $0x30] sm:$0xff] }
   0x7   :  { %57 = vadd.xlane.f32.xlu0 %v56_v3  ;;  %3761 = vmatpush3.bf16.msra.mxu1 %v3758_v19  ;;  %v3774_v31 = vpack.c.bf16 %v423_v30, %v422_v28  ;;  %v3228_v41 = vld [vmem:[%s4582_s2] ss:$0 sm:$0xff]  ;;  %v103_v48 = vld [vmem:[%s4583_s3 + $0x38] sm:$0xff]  ;;  %v424_v49 = vld [vmem:[%s4584_s4 + $0x30] sm:$0xff] }
   0x8   :  { %3739 = vmatprep.subr.bf16.mxu0 %v3738_v23  ;;  %3763 = vmatprep.subr.bf16.mxu1 %v3762_v25  ;;  %v425_v50 = vld [vmem:[%s4584_s4 + $0x38] sm:$0xff]  ;;  %v104_v52 = vld [vmem:[%s4583_s3 + $0x40] sm:$0xff]  ;;  %v3746_v53 = vpack.c.bf16 %v103_v48, %v102_v46  ;;  %v105_v55 = vld [vmem:[%s4583_s3 + $0x48] sm:$0xff] }
   0x9   :  { %v3778_v54 = vpack.c.bf16 %v425_v50, %v424_v49  ;;  %v430_v56 = vld [vmem:[%s4584_s4 + $0x60] sm:$0xff]  ;;  %v431_v57 = vld [vmem:[%s4584_s4 + $0x68] sm:$0xff]  ;;  %v3750_v58 = vpack.c.bf16 %v105_v55, %v104_v52  ;;  %v106_v60 = vld [vmem:[%s4583_s3 + $0x50] sm:$0xff] }
   0xa   :  { %3741 = vmatpush3.bf16.msra.mxu0 %v3738_v23  ;;  %v3790_v59 = vpack.c.bf16 %v431_v57, %v430_v56  ;;  %v107_v61 = vld [vmem:[%s4583_s3 + $0x58] sm:$0xff]  ;;  %v432_v62 = vld [vmem:[%s4584_s4 + $0x70] sm:$0xff]  ;;  %v426_v15 = vld [vmem:[%s4584_s4 + $0x40] sm:$0xff] }
   0xb   :  { %3765 = vmatpush3.bf16.msra.mxu1 %v3762_v25  ;;  %3743 = vmatprep.subr.bf16.mxu0 %v3742_v29  ;;  %v433_v63 = vld [vmem:[%s4584_s4 + $0x78] sm:$0xff]  ;;  %v3754_v2 = vpack.c.bf16 %v107_v61, %v106_v60  ;;  %v427_v16 = vld [vmem:[%s4584_s4 + $0x48] sm:$0xff]  ;;  %v746_v18 = vld [vmem:[%s4585_s5 + $0x60] sm:$0xff] }
   0xc   :  { %3775 = vmatprep.subr.bf16.mxu1 %v3774_v31  ;;  %v3794_v3 = vpack.c.bf16 %v433_v63, %v432_v62  ;;  %v747_v19 = vld [vmem:[%s4585_s5 + $0x68] sm:$0xff]  ;;  %v3782_v20 = vpack.c.bf16 %v427_v16, %v426_v15  ;;  %v428_v22 = vld [vmem:[%s4584_s4 + $0x50] sm:$0xff]  ;;  %v429_v23 = vld [vmem:[%s4584_s4 + $0x58] sm:$0xff] }
   0xd   :  { %v3822_v21 = vpack.c.bf16 %v747_v19, %v746_v18  ;;  %v748_v24 = vld [vmem:[%s4585_s5 + $0x70] sm:$0xff]  ;;  %v749_v25 = vld [vmem:[%s4585_s5 + $0x78] sm:$0xff]  ;;  %v3786_v26 = vpack.c.bf16 %v429_v23, %v428_v22  ;;  %v734_v27 = vld [vmem:[%s4585_s5] sm:$0xff] }
   0xe   :  { %v735_v28 = vld [vmem:[%s4585_s5 + $0x8] sm:$0xff] }
   0xf   :  { %v3798_v30 = vpack.c.bf16 %v735_v28, %v734_v27 }
  0x90   :  { %v55_v4 = vpop.xlane.xlu0 %54 }
  0x91   :  { %v60_v5 = vmul.f32 0.03125, %v55_v4  ;;  %v418_v4 = vld [vmem:[%s4584_s4] sm:$0xff] }
  0x93   :  { %v62_v6 = vsub.f32 %v4026_v0, %v60_v5  ;;  %v419_v5 = vld [vmem:[%s4584_s4 + $0x8] sm:$0xff] }
  0x94   :  { %v58_v7 = vpop.xlane.xlu0 %57 }
  0x95   :  { %v61_v8 = vmul.f32 0.03125, %v58_v7  ;;  %v64_v9 = vmul.f32 %v62_v6, %v62_v6  ;;  %v739_v7 = vld [vmem:[%s4585_s5 + $0x28] sm:$0xff] }
  0x97   :  { %v63_v10 = vsub.f32 %v4031_v1, %v61_v8  ;;  %v66_v11 = vsel %vm52_vm0, %v64_v9, 0.0  ;;  %v3766_v8 = vpack.c.bf16 %v419_v5, %v418_v4 }
  0x98   :  { %67 = vadd.xlane.f32.xlu1 %v66_v11  ;;  %v421_v11 = vld [vmem:[%s4584_s4 + $0x18] sm:$0xff] }
  0x99   :  { %v65_v12 = vmul.f32 %v63_v10, %v63_v10 }
  0x9b   :  { %v69_v13 = vsel %vm52_vm0, %v65_v12, 0.0  ;;  %v740_v12 = vld [vmem:[%s4585_s5 + $0x30] sm:$0xff] }
  0x9c   :  { %70 = vadd.xlane.f32.xlu1 %v69_v13  ;;  %v741_v13 = vld [vmem:[%s4585_s5 + $0x38] sm:$0xff] }
  0x9d   :  { %v3810_v17 = vpack.c.bf16 %v741_v13, %v740_v12 }
 0x125   :  { %v68_v32 = vpop.xlane.xlu1 %67 }
 0x126   :  { %v72_v33 = vmul.f32 0.03125, %v68_v32  ;;  %v737_v32 = vld [vmem:[%s4585_s5 + $0x18] sm:$0xff] }
 0x128   :  { %v74_v34 = vadd.f32 1e-05, %v72_v33 }
 0x129   :  { %v71_v35 = vpop.xlane.xlu1 %70 }
 0x12a   :  { %3875 = vrsqrt.f32 %v74_v34  ;;  %v73_v36 = vmul.f32 0.03125, %v71_v35  ;;  %v742_v34 = vld [vmem:[%s4585_s5 + $0x40] sm:$0xff]  ;;  %v743_v35 = vld [vmem:[%s4585_s5 + $0x48] sm:$0xff] }
 0x12c   :  { %v75_v37 = vadd.f32 1e-05, %v73_v36  ;;  %v3814_v36 = vpack.c.bf16 %v743_v35, %v742_v34 }
 0x12e   :  { %3877 = vrsqrt.f32 %v75_v37  ;;  %v744_v37 = vld [vmem:[%s4585_s5 + $0x50] sm:$0xff] }
 0x134   :  { %v3876_v38 = vpop.eup %3875 }
 0x135   :  { %v78_v40 = vmul.f32 %v3876_v38, %v62_v6  ;;  %v738_v6 = vld [vmem:[%s4585_s5 + $0x20] sm:$0xff]  ;;  %v745_v38 = vld [vmem:[%s4585_s5 + $0x58] sm:$0xff] }
 0x136   :  { %v3806_v9 = vpack.c.bf16 %v739_v7, %v738_v6 }
 0x137   :  { %v86_v42 = vmul.f32 %v3227_v39, %v78_v40  ;;  %v3943_v40 = vmov 0.0  }
 0x138   :  { %v3878_v43 = vpop.eup %3877 }
 0x139   :  { %v4083_v44 = vadd.f32 %v3228_v41, %v86_v42  ;;  %v79_v45 = vmul.f32 %v3878_v43, %v63_v10  ;;  %v420_v10 = vld [vmem:[%s4584_s4 + $0x10] sm:$0xff] }
 0x13a   :  { %v3770_v14 = vpack.c.bf16 %v421_v11, %v420_v10 }
 0x13b   :  { %v87_v47 = vmul.f32 %v3227_v39, %v79_v45  ;;  %3444 = vmatprep.mubr.msk.f32.mxu0 %vm52_vm0, %v4083_v44  ;;  %3477 = vmatprep.mubr.msk.f32.mxu1 %vm52_vm0, %v4083_v44  ;;  %v3818_v39 = vpack.c.bf16 %v745_v38, %v744_v37 }
 0x13d   :  { %v4101_v51 = vadd.f32 %v3228_v41, %v87_v47 }
 0x13f   :  { %3445 = vmatmul.mubr.msk.f32.vlgmr.msra.gmra.mrb[0].mxu0 %vm52_vm0, %v4101_v51  ;;  %3478 = vmatmul.mubr.msk.f32.vlgmr.msra.gmra.mrb[0].mxu1 %vm52_vm0, %v4101_v51 }
 0x140   :  { %3745 = vmatpush3.bf16.msra.mxu0 %v3742_v29  ;;  %3777 = vmatpush3.bf16.msra.mxu1 %v3774_v31  ;;  %v3826_v29 = vpack.c.bf16 %v749_v25, %v748_v24  ;;  %v736_v31 = vld [vmem:[%s4585_s5 + $0x10] sm:$0xff] }
 0x141   :  { %3455 = vmatprep.mubr.msk.f32.mxu0 %vm52_vm0, %v4083_v44  ;;  %3499 = vmatprep.mubr.msk.f32.mxu1 %vm52_vm0, %v4083_v44  ;;  %v3802_v33 = vpack.c.bf16 %v737_v32, %v736_v31 }
 0x142   :  { %3747 = vmatprep.subr.bf16.mxu0 %v3746_v53  ;;  %3779 = vmatprep.subr.bf16.mxu1 %v3778_v54 }
 0x144   :  { %3749 = vmatpush3.bf16.msra.mxu0 %v3746_v53  ;;  %3781 = vmatpush3.bf16.msra.mxu1 %v3778_v54 }
 0x145   :  { %3751 = vmatprep.subr.bf16.mxu0 %v3750_v58  ;;  %3791 = vmatprep.subr.bf16.mxu1 %v3790_v59 }
 0x147   :  { %3456 = vmatmul.mubr.msk.f32.vlgmr.msra.gmra.mrb[2].mxu0 %vm52_vm0, %v4101_v51  ;;  %3500 = vmatmul.mubr.msk.f32.vlgmr.msra.gmra.mrb[2].mxu1 %vm52_vm0, %v4101_v51 }
 0x148   :  { %3753 = vmatpush3.bf16.msra.mxu0 %v3750_v58  ;;  %3466 = vmatprep.mubr.msk.f32.mxu0 %vm52_vm0, %v4083_v44 }
 0x149   :  { %3793 = vmatpush3.bf16.msra.mxu1 %v3790_v59  ;;  %3521 = vmatprep.mubr.msk.f32.mxu1 %vm52_vm0, %v4083_v44 }
 0x14a   :  { %3755 = vmatprep.subr.bf16.mxu0 %v3754_v2  ;;  %3795 = vmatprep.subr.bf16.mxu1 %v3794_v3 }
 0x14c   :  { %3757 = vmatpush3.bf16.msra.mxu0 %v3754_v2 }
 0x14d   :  { %3797 = vmatpush3.bf16.msra.mxu1 %v3794_v3  ;;  %3767 = vmatprep.subr.bf16.mxu0 %v3766_v8  ;;  %v1050_v3 = vlaneseq }
 0x14e   :  { %3807 = vmatprep.subr.bf16.mxu1 %v3806_v9 }
 0x14f   :  { %3467 = vmatmul.mubr.msk.f32.vlgmr.msra.gmra.mrb[4].mxu0 %vm52_vm0, %v4101_v51  ;;  %v1051_v6 = vshrl.u32 %v1050_v3, 7  ;;  %v1053_v7 = vand.u32 127, %v1050_v3 }
 0x150   :  { %3522 = vmatmul.mubr.msk.f32.vlgmr.msra.gmra.mrb[4].mxu1 %vm52_vm0, %v4101_v51  ;;  %3769 = vmatpush3.bf16.msra.mxu0 %v3766_v8 }
 0x151   :  { %3488 = vmatprep.mubr.msk.f32.mxu0 %vm52_vm0, %v4083_v44  ;;  %3809 = vmatpush3.bf16.msra.mxu1 %v3806_v9  ;;  %vm4299_vm3 = vcmp.le.s32.totalorder %v1053_v7, %v1051_v6 }
 0x152   :  { %3543 = vmatprep.mubr.msk.f32.mxu1 %vm52_vm0, %v4083_v44  ;;  %3771 = vmatprep.subr.bf16.mxu0 %v3770_v14 }
 0x153   :  { %3811 = vmatprep.subr.bf16.mxu1 %v3810_v17 }
 0x154   :  { %3773 = vmatpush3.bf16.msra.mxu0 %v3770_v14 }
 0x155   :  { %3813 = vmatpush3.bf16.msra.mxu1 %v3810_v17  ;;  %3783 = vmatprep.subr.bf16.mxu0 %v3782_v20 }
 0x156   :  { %3823 = vmatprep.subr.bf16.mxu1 %v3822_v21 }
 0x157   :  { %3489 = vmatmul.mubr.msk.f32.vlgmr.msra.gmra.mrb[6].mxu0 %vm52_vm0, %v4101_v51 }
 0x158   :  { %3544 = vmatmul.mubr.msk.f32.vlgmr.msra.gmra.mrb[6].mxu1 %vm52_vm0, %v4101_v51  ;;  %3785 = vmatpush3.bf16.msra.mxu0 %v3782_v20 }
 0x159   :  { %3510 = vmatprep.mubr.msk.f32.mxu0 %vm52_vm0, %v4083_v44  ;;  %3825 = vmatpush3.bf16.msra.mxu1 %v3822_v21 }
 0x15a   :  { %3565 = vmatprep.mubr.msk.f32.mxu1 %vm52_vm0, %v4083_v44  ;;  %3787 = vmatprep.subr.bf16.mxu0 %v3786_v26 }
 0x15b   :  { %3827 = vmatprep.subr.bf16.mxu1 %v3826_v29 }
 0x15c   :  { %3789 = vmatpush3.bf16.msra.mxu0 %v3786_v26 }
 0x15d   :  { %3829 = vmatpush3.bf16.msra.mxu1 %v3826_v29  ;;  %3799 = vmatprep.subr.bf16.mxu0 %v3798_v30 }
 0x15e   :  { %3583 = vmatprep.subr.mxu1 %v3943_v40 }
 0x15f   :  { %3511 = vmatmul.mubr.msk.f32.vlgmr.msra.gmra.mrb[8].mxu0 %vm52_vm0, %v4101_v51 }
 0x160   :  { %3566 = vmatmul.mubr.msk.f32.vlgmr.msra.gmra.mrb[8].mxu1 %vm52_vm0, %v4101_v51  ;;  %3801 = vmatpush3.bf16.msra.mxu0 %v3798_v30 }
 0x161   :  { %3532 = vmatprep.mubr.msk.f32.mxu0 %vm52_vm0, %v4083_v44  ;;  %3803 = vmatprep.subr.bf16.mxu0 %v3802_v33 }
 0x162   :  { %3585 = vmatprep.mubr.msk.f32.mxu1 %vm3944_vm1, %v3943_v40 }
 0x164   :  { %3805 = vmatpush3.bf16.msra.mxu0 %v3802_v33 }
 0x165   :  { %3815 = vmatprep.subr.bf16.mxu0 %v3814_v36 }
 0x167   :  { %3533 = vmatmul.mubr.msk.f32.vlgmr.msra.gmra.mrb[10].mxu0 %vm52_vm0, %v4101_v51 }
 0x168   :  { %3817 = vmatpush3.bf16.msra.mxu0 %v3814_v36  ;;  %3554 = vmatprep.mubr.msk.f32.mxu0 %vm52_vm0, %v4083_v44 }
 0x169   :  { %3819 = vmatprep.subr.bf16.mxu0 %v3818_v39 }
 0x16c   :  { %3821 = vmatpush3.bf16.msra.mxu0 %v3818_v39 }
 0x16d   :  { %3568 = vmatprep.subr.mxu0 %v3943_v40 }
 0x16f   :  { %3555 = vmatmul.mubr.msk.f32.vlgmr.msra.gmra.mrb[12].mxu0 %vm52_vm0, %v4101_v51 }
 0x170   :  { %3570 = vmatprep.mubr.msk.f32.mxu0 %vm3944_vm1, %v3943_v40 }
 0x212   :  { %v4249_v41 = vpop.f32.mrb[0].mxu0  ;;  %v4251_v42 = vpop.f32.mrb[0].mxu1 }
 0x213   :  { %v184_v43 = vpop.f32.mrb[1].mxu0  ;;  %v409_v44 = vpop.f32.mrb[1].mxu1 }
 0x21a   :  { %v4253_v45 = vpop.f32.mrb[2].mxu0  ;;  %v4255_v46 = vpop.f32.mrb[2].mxu1 }
 0x21b   :  { %v259_v47 = vpop.f32.mrb[3].mxu0  ;;  %v575_v48 = vpop.f32.mrb[3].mxu1 }
 0x222   :  { %v4257_v49 = vpop.f32.mrb[4].mxu0 }
 0x223   :  { %v4259_v50 = vpop.f32.mrb[4].mxu1  ;;  %v334_v51 = vpop.f32.mrb[5].mxu0 }
 0x224   :  { %v725_v52 = vpop.f32.mrb[5].mxu1 }
 0x225   :  { %3584 = vmatpush3.xpose.msk.msra.mxu1 %vm1055_vm2, %v725_v52 }
 0x226   :  { %3593 = vmatprep.subr.mxu1 %v3943_v40 }
 0x228   :  { %3586 = vmatmul.mubr.msk.f32.vlgmr.msra.gmra.mrb[10].mxu1 %vm1055_vm2, %v409_v44 }
 0x229   :  { %3595 = vmatprep.mubr.msk.f32.mxu1 %vm3944_vm1, %v3943_v40 }
 0x22a   :  { %v4266_v53 = vpop.f32.mrb[6].mxu0 }
 0x22b   :  { %v4268_v54 = vpop.f32.mrb[6].mxu1  ;;  %v500_v55 = vpop.f32.mrb[7].mxu0 }
 0x22c   :  { %v891_v56 = vpop.f32.mrb[7].mxu1  ;;  %3569 = vmatpush3.xpose.msk.msra.mxu0 %vm1055_vm2, %v500_v55 }
 0x22d   :  { %3594 = vmatpush3.msra.mxu1 %v891_v56  ;;  %3573 = vmatprep.subr.mxu0 %v3943_v40 }
 0x22e   :  { %3603 = vmatprep.subr.mxu1 %v3943_v40 }
 0x22f   :  { %3571 = vmatmul.mubr.msk.f32.vlgmr.msra.gmra.mrb[14].mxu0 %vm1055_vm2, %v184_v43 }
 0x230   :  { %3574 = vmatpush3.xpose.msk.msra.mxu0 %vm1055_vm2, %v575_v48  ;;  %3575 = vmatprep.mubr.msk.f32.mxu0 %vm3944_vm1, %v3943_v40 }
 0x231   :  { %3578 = vmatprep.subr.mxu0 %v3943_v40 }
 0x232   :  { %v4278_v57 = vpop.f32.mrb[8].mxu0 }
 0x233   :  { %v4280_v58 = vpop.f32.mrb[8].mxu1  ;;  %v650_v59 = vpop.f32.mrb[9].mxu0  ;;  %3576 = vmatmul.mubr.msk.f32.vlgmr.msra.gmra.mrb[16].mxu0 %vm1055_vm2, %v259_v47 }
 0x234   :  { %v4283_v60 = vpop.f32.mrb[9].mxu1  ;;  %3579 = vmatpush3.xpose.msk.msra.mxu0 %vm1055_vm2, %v650_v59  ;;  %3580 = vmatprep.mubr.msk.f32.mxu0 %vm3944_vm1, %v3943_v40 }
 0x235   :  { %3588 = vmatprep.subr.mxu0 %v3943_v40 }
 0x237   :  { %3581 = vmatmul.mubr.msk.f32.vlgmr.msra.gmra.mrb[18].mxu0 %vm1055_vm2, %v334_v51 }
 0x238   :  { %3590 = vmatprep.mubr.msk.f32.mxu0 %vm3944_vm1, %v3943_v40 }
 0x23a   :  { %v4292_v61 = vpop.f32.mrb[10].mxu0 }
 0x23b   :  { %v816_v62 = vpop.f32.mrb[11].mxu0 }
 0x23c   :  { %3589 = vmatpush3.msra.mxu0 %v816_v62 }
 0x23d   :  { %3598 = vmatprep.subr.mxu0 %v3943_v40 }
 0x242   :  { %v4295_v63 = vpop.f32.mrb[12].mxu0 }
 0x243   :  { %v4297_v2 = vpop.f32.mrb[13].mxu0 }
 0x2fb   :  { %v1356_v4 = vpop.f32.mrb[10].mxu1 }
 0x2fc   :  { %v3587_v5 = vpop.f32.mrb[11].mxu1  ;;  %v1365_v17 = vsel %vm4299_vm3, %v1356_v4, -1e+30 }
 0x2fd   :  { %v1375_v21 = vsel %vm1055_vm2, %v1365_v17, -inf }
 0x302   :  { %v1128_v9 = vpop.f32.mrb[14].mxu0 }
 0x303   :  { %v1362_v10 = vsel %vm4299_vm3, %v1128_v9, -1e+30  ;;  %v3572_v11 = vpop.f32.mrb[15].mxu0  ;;  %v4352_v9 = vld [vmem:[%s4586_s6 + $0x10] sm:$0xff] }
 0x304   :  { %v1366_v12 = vsel %vm1055_vm2, %v1362_v10, -inf }
 0x305   :  { %1367 = vmax.xlane.f32.xlu0 %v1366_v12  ;;  %v4361_v12 = vld [vmem:[%s4586_s6 + $0x18] sm:$0xff] }
 0x306   :  { %v1204_v13 = vpop.f32.mrb[16].mxu0 }
 0x307   :  { %v1363_v14 = vsel %vm4299_vm3, %v1204_v13, -1e+30  ;;  %v3577_v15 = vpop.f32.mrb[17].mxu0 }
 0x308   :  { %v1369_v16 = vsel %vm1055_vm2, %v1363_v14, -inf }
 0x309   :  { %1370 = vmax.xlane.f32.xlu1 %v1369_v16 }
 0x30a   :  { %v1280_v18 = vpop.f32.mrb[18].mxu0 }
 0x30b   :  { %v1364_v19 = vsel %vm4299_vm3, %v1280_v18, -1e+30  ;;  %v3582_v20 = vpop.f32.mrb[19].mxu0 }
 0x30c   :  { %v1372_v22 = vsel %vm1055_vm2, %v1364_v19, -inf }
 0x30d   :  { %1376 = vmax.xlane.f32.xlu1 %v1375_v21  ;;  %1373 = vmax.xlane.f32.xlu0 %v1372_v22 }
 0x392   :  { %v1368_v23 = vpop.xlane.xlu0 %1367 }
 0x393   :  { %v1378_v24 = vsub.f32 %v1362_v10, %v1368_v23 }
 0x395   :  { %v1382_v25 = vmul.f32 1.442695, %v1378_v24 }
 0x396   :  { %v1371_v26 = vpop.xlane.xlu1 %1370 }
 0x397   :  { %3879 = vpow2.f32 %v1382_v25  ;;  %v1379_v27 = vsub.f32 %v1363_v14, %v1371_v26 }
 0x399   :  { %v1384_v28 = vmul.f32 1.442695, %v1379_v27 }
 0x39a   :  { %v1377_v29 = vpop.xlane.xlu1 %1376  ;;  %v1374_v30 = vpop.xlane.xlu0 %1373 }
 0x39b   :  { %3881 = vpow2.f32 %v1384_v28  ;;  %v1381_v31 = vsub.f32 %v1365_v17, %v1377_v29  ;;  %v1380_v32 = vsub.f32 %v1364_v19, %v1374_v30 }
 0x39d   :  { %v1388_v33 = vmul.f32 1.442695, %v1381_v31  ;;  %v1386_v34 = vmul.f32 1.442695, %v1380_v32 }
 0x39f   :  { %3883 = vpow2.f32 %v1388_v33 }
 0x3a0   :  { %3885 = vpow2.f32 %v1386_v34 }
 0x3a1   :  { %v3880_v35 = vpop.eup %3879 }
 0x3a2   :  { %v1390_v36 = vsel %vm1055_vm2, %v3880_v35, 0.0 }
 0x3a3   :  { %1391 = vadd.xlane.f32.xlu0 %v1390_v36 }
 0x3a5   :  { %v3882_v37 = vpop.eup %3881 }
 0x3a6   :  { %v1393_v38 = vsel %vm1055_vm2, %v3882_v37, 0.0 }
 0x3a7   :  { %1394 = vadd.xlane.f32.xlu1 %v1393_v38 }
 0x3a9   :  { %v3884_v39 = vpop.eup %3883 }
 0x3aa   :  { %v3886_v43 = vpop.eup %3885  ;;  %v1399_v44 = vsel %vm1055_vm2, %v3884_v39, 0.0 }
 0x3ab   :  { %1400 = vadd.xlane.f32.xlu1 %v1399_v44  ;;  %v1396_v47 = vsel %vm1055_vm2, %v3886_v43, 0.0 }
 0x3ac   :  { %1397 = vadd.xlane.f32.xlu0 %v1396_v47 }
 0x430   :  { %v1392_v48 = vpop.xlane.xlu0 %1391 }
 0x431   :  { %3887 = vrcp.f32 %v1392_v48 }
 0x434   :  { %v1395_v51 = vpop.xlane.xlu1 %1394 }
 0x435   :  { %3889 = vrcp.f32 %v1395_v51 }
 0x438   :  { %v1401_v52 = vpop.xlane.xlu1 %1400 }
 0x439   :  { %3891 = vrcp.f32 %v1401_v52  ;;  %v1398_v55 = vpop.xlane.xlu0 %1397 }
 0x43a   :  { %3893 = vrcp.f32 %v1398_v55 }
 0x43b   :  { %v3888_v56 = vpop.eup %3887 }
 0x43c   :  { %v1406_v59 = vmul.f32 %v3888_v56, %v3880_v35 }
 0x43e   :  { %3591 = vmatmul.mubr.msk.f32.vlgmr.msra.gmra.mrb[20].mxu0 %vm1055_vm2, %v1406_v59 }
 0x43f   :  { %v3890_v62 = vpop.eup %3889  ;;  %3599 = vmatpush3.msra.mxu0 %v4297_v2  ;;  %3600 = vmatprep.mubr.msk.f32.mxu0 %vm3944_vm1, %v3943_v40  ;;  %v4344_v2 = vld [vmem:[%s4586_s6 + $0x8] sm:$0xff] }
 0x440   :  { %v1407_v3 = vmul.f32 %v3890_v62, %v3882_v37  ;;  %3608 = vmatprep.subr.mxu0 %v3943_v40 }
 0x442   :  { %3596 = vmatmul.mubr.msk.f32.vlgmr.msra.gmra.mrb[12].mxu1 %vm1055_vm2, %v1407_v3 }
 0x443   :  { %v3892_v4 = vpop.eup %3891  ;;  %3604 = vmatpush3.msra.mxu1 %v4283_v60  ;;  %3605 = vmatprep.mubr.msk.f32.mxu1 %vm3944_vm1, %v3943_v40  ;;  %v4338_v60 = vld [vmem:[%s4586_s6] sm:$0xff] }
 0x444   :  { %v3894_v5 = vpop.eup %3893  ;;  %v1409_v6 = vmul.f32 %v3892_v4, %v3884_v39  ;;  %3613 = vmatprep.subr.mxu1 %v3943_v40  ;;  %v4426_v4 = vld [vmem:[%s4587_s7] ss:$0 sm:$0xff] }
 0x445   :  { %v1408_v7 = vmul.f32 %v3894_v5, %v3886_v43 }
 0x446   :  { %3606 = vmatmul.mubr.msk.f32.vlgmr.msra.gmra.mrb[14].mxu1 %vm1055_vm2, %v1409_v6 }
 0x447   :  { %3601 = vmatmul.mubr.msk.f32.vlgmr.msra.gmra.mrb[22].mxu0 %vm1055_vm2, %v1408_v7  ;;  %3615 = vmatprep.mubr.msk.f32.mxu1 %vm3944_vm1, %v3943_v40 }
 0x448   :  { %3610 = vmatprep.mubr.msk.f32.mxu0 %vm3944_vm1, %v3943_v40  ;;  %3609 = vmatpush3.msra.mxu0 %v4338_v60 }
 0x449   :  { %3618 = vmatprep.subr.mxu0 %v3943_v40  ;;  %3614 = vmatpush3.msra.mxu1 %v4344_v2 }
 0x44a   :  { %3623 = vmatprep.subr.mxu1 %v3943_v40 }
 0x511   :  { %v1479_v10 = vpop.f32.mrb[20].mxu0 }
 0x512   :  { %v3592_v11 = vpop.f32.mrb[21].mxu0  ;;  %3611 = vmatmul.mubr.msk.f32.vlgmr.msra.gmra.mrb[24].mxu0 %vm1055_vm2, %v1479_v10 }
 0x513   :  { %3619 = vmatpush3.msra.mxu0 %v4352_v9  ;;  %3620 = vmatprep.mubr.msk.f32.mxu0 %vm3944_vm1, %v3943_v40 }
 0x514   :  { %3628 = vmatprep.subr.mxu0 %v3943_v40 }
 0x515   :  { %v1552_v13 = vpop.f32.mrb[12].mxu1 }
 0x516   :  { %v3597_v14 = vpop.f32.mrb[13].mxu1  ;;  %3616 = vmatmul.mubr.msk.f32.vlgmr.msra.gmra.mrb[16].mxu1 %vm1055_vm2, %v1552_v13 }
 0x517   :  { %3624 = vmatpush3.msra.mxu1 %v4361_v12  ;;  %3625 = vmatprep.mubr.msk.f32.mxu1 %vm3944_vm1, %v3943_v40 }
 0x518   :  { %3633 = vmatprep.subr.mxu1 %v3943_v40 }
 0x519   :  { %v1698_v15 = vpop.f32.mrb[14].mxu1 }
 0x51a   :  { %v1625_v16 = vpop.f32.mrb[22].mxu0  ;;  %v3607_v17 = vpop.f32.mrb[15].mxu1  ;;  %3626 = vmatmul.mubr.msk.f32.vlgmr.msra.gmra.mrb[18].mxu1 %vm1055_vm2, %v1698_v15 }
 0x51b   :  { %v3602_v18 = vpop.f32.mrb[23].mxu0  ;;  %3621 = vmatmul.mubr.msk.f32.vlgmr.msra.gmra.mrb[26].mxu0 %vm1055_vm2, %v1625_v16  ;;  %3635 = vmatprep.mubr.msk.f32.mxu1 %vm3944_vm1, %v3943_v40 }
 0x51c   :  { %3629 = vmatpush3.xpose.msk.msra.mxu0 %vm1055_vm2, %v4266_v53  ;;  %3630 = vmatprep.mubr.msk.f32.mxu0 %vm3944_vm1, %v3943_v40 }
 0x51d   :  { %3638 = vmatprep.subr.mxu0 %v3943_v40 }
 0x51e   :  { %3634 = vmatpush3.xpose.msk.msra.mxu1 %vm1055_vm2, %v4255_v46 }
 0x51f   :  { %3631 = vmatmul.mubr.msk.f32.vlgmr.msra.gmra.mrb[28].mxu0 %vm1055_vm2, %v4249_v41  ;;  %3643 = vmatprep.subr.mxu1 %v3943_v40 }
 0x520   :  { %3639 = vmatpush3.xpose.msk.msra.mxu0 %vm1055_vm2, %v4278_v57  ;;  %3640 = vmatprep.mubr.msk.f32.mxu0 %vm3944_vm1, %v3943_v40 }
 0x521   :  { %3636 = vmatmul.mubr.msk.f32.vlgmr.msra.gmra.mrb[20].mxu1 %vm1055_vm2, %v4253_v45  ;;  %3648 = vmatprep.subr.mxu0 %v3943_v40 }
 0x522   :  { %3644 = vmatpush3.xpose.msk.msra.mxu1 %vm1055_vm2, %v4259_v50  ;;  %3645 = vmatprep.mubr.msk.f32.mxu1 %vm3944_vm1, %v3943_v40 }
 0x523   :  { %3641 = vmatmul.mubr.msk.f32.vlgmr.msra.gmra.mrb[30].mxu0 %vm1055_vm2, %v4257_v49  ;;  %3653 = vmatprep.subr.mxu1 %v3943_v40 }
 0x524   :  { %3649 = vmatpush3.msra.mxu0 %v4292_v61  ;;  %3650 = vmatprep.mubr.msk.f32.mxu0 %vm3944_vm1, %v3943_v40 }
 0x525   :  { %3646 = vmatmul.mubr.msk.f32.vlgmr.msra.gmra.mrb[22].mxu1 %vm1055_vm2, %v4251_v42  ;;  %3658 = vmatprep.subr.mxu0 %v3943_v40 }
 0x526   :  { %3654 = vmatpush3.msra.mxu1 %v4268_v54  ;;  %3655 = vmatprep.mubr.msk.f32.mxu1 %vm3944_vm1, %v3943_v40 }
 0x527   :  { %3663 = vmatprep.subr.mxu1 %v3943_v40 }
 0x5e5   :  { %v1775_v41 = vpop.f32.mrb[24].mxu0 }
 0x5e6   :  { %v3612_v45 = vpop.f32.mrb[25].mxu0  ;;  %v1998_v49 = vsel %vm52_vm0, %v1775_v41, 0.0 }
 0x5e9   :  { %v1848_v46 = vpop.f32.mrb[16].mxu1 }
 0x5ea   :  { %v1999_v50 = vsel %vm52_vm0, %v1848_v46, 0.0  ;;  %v3617_v53 = vpop.f32.mrb[17].mxu1 }
 0x5eb   :  { %v2000_v57 = vadd.f32 %v1999_v50, %v1998_v49 }
 0x5ed   :  { %v1994_v61 = vpop.f32.mrb[18].mxu1 }
 0x5ee   :  { %v1921_v42 = vpop.f32.mrb[26].mxu0  ;;  %v3627_v19 = vpop.f32.mrb[19].mxu1  ;;  %v2003_v22 = vsel %vm52_vm0, %v1994_v61, 0.0 }
 0x5ef   :  { %v2001_v20 = vsel %vm52_vm0, %v1921_v42, 0.0  ;;  %v3622_v54 = vpop.f32.mrb[27].mxu0 }
 0x5f0   :  { %v2002_v21 = vadd.f32 %v2001_v20, %v2000_v57 }
 0x5f2   :  { %v2004_v23 = vadd.f32 %v2003_v22, %v2002_v21  ;;  %v2077_v24 = vpop.f32.mrb[28].mxu0 }
 0x5f3   :  { %v2309_v25 = vsel %vm4299_vm3, %v2077_v24, -1e+30  ;;  %v3632_v26 = vpop.f32.mrb[29].mxu0 }
 0x5f4   :  { %v2153_v27 = vpop.f32.mrb[20].mxu1  ;;  %v2313_v28 = vsel %vm1055_vm2, %v2309_v25, -inf  ;;  %v2959_v6 = vadd.f32 %v4426_v4, %v2004_v23 }
 0x5f5   :  { %v2310_v29 = vsel %vm4299_vm3, %v2153_v27, -1e+30  ;;  %v3637_v30 = vpop.f32.mrb[21].mxu1  ;;  %2314 = vmax.xlane.f32.xlu0 %v2313_v28  ;;  %v4463_v27 = vld [vmem:[%s4588_s8] ss:$0 sm:$0xff] }
 0x5f6   :  { %v2229_v31 = vpop.f32.mrb[30].mxu0  ;;  %v2316_v32 = vsel %vm1055_vm2, %v2310_v29, -inf  ;;  %v4433_v15 = vadd.f32 %v2959_v6, %v4026_v0  ;;  %v4470_v30 = vld [vmem:[%s4589_s9] ss:$0 sm:$0xff] }
 0x5f7   :  { %v2311_v33 = vsel %vm4299_vm3, %v2229_v31, -1e+30  ;;  %2317 = vmax.xlane.f32.xlu1 %v2316_v32  ;;  %v3642_v34 = vpop.f32.mrb[31].mxu0 }
 0x5f8   :  { %v2305_v35 = vpop.f32.mrb[22].mxu1  ;;  %v2319_v36 = vsel %vm1055_vm2, %v2311_v33, -inf  ;;  %v2965_v18 = vsel %vm52_vm0, %v4433_v15, 0.0 }
 0x5f9   :  { %v2312_v37 = vsel %vm4299_vm3, %v2305_v35, -1e+30  ;;  %v3647_v38 = vpop.f32.mrb[23].mxu1  ;;  %2320 = vmax.xlane.f32.xlu0 %v2319_v36 }
 0x5fa   :  { %v2322_v39 = vsel %vm1055_vm2, %v2312_v37, -inf }
 0x5fb   :  { %2323 = vmax.xlane.f32.xlu1 %v2322_v39 }
 0x682   :  { %v2315_v43 = vpop.xlane.xlu0 %2314 }
 0x683   :  { %v2325_v44 = vsub.f32 %v2309_v25, %v2315_v43 }
 0x684   :  { %v2318_v47 = vpop.xlane.xlu1 %2317 }
 0x685   :  { %v2329_v48 = vmul.f32 1.442695, %v2325_v44  ;;  %v2326_v51 = vsub.f32 %v2310_v29, %v2318_v47 }
 0x686   :  { %v2321_v52 = vpop.xlane.xlu0 %2320 }
 0x687   :  { %3895 = vpow2.f32 %v2329_v48  ;;  %v2331_v55 = vmul.f32 1.442695, %v2326_v51  ;;  %v2327_v56 = vsub.f32 %v2311_v33, %v2321_v52 }
 0x688   :  { %v2324_v59 = vpop.xlane.xlu1 %2323 }
 0x689   :  { %3897 = vpow2.f32 %v2331_v55  ;;  %v2333_v62 = vmul.f32 1.442695, %v2327_v56  ;;  %v2328_v3 = vsub.f32 %v2312_v37, %v2324_v59 }
 0x68b   :  { %3899 = vpow2.f32 %v2333_v62  ;;  %v2335_v8 = vmul.f32 1.442695, %v2328_v3 }
 0x68d   :  { %3901 = vpow2.f32 %v2335_v8 }
 0x691   :  { %v3896_v5 = vpop.eup %3895 }
 0x692   :  { %v2337_v7 = vsel %vm1055_vm2, %v3896_v5, 0.0 }
 0x693   :  { %v3898_v10 = vpop.eup %3897  ;;  %2338 = vadd.xlane.f32.xlu0 %v2337_v7 }
 0x694   :  { %v2340_v11 = vsel %vm1055_vm2, %v3898_v10, 0.0 }
 0x695   :  { %v3900_v13 = vpop.eup %3899  ;;  %2341 = vadd.xlane.f32.xlu1 %v2340_v11 }
 0x696   :  { %v2343_v14 = vsel %vm1055_vm2, %v3900_v13, 0.0 }
 0x697   :  { %v3902_v16 = vpop.eup %3901  ;;  %2344 = vadd.xlane.f32.xlu0 %v2343_v14  ;;  %v3007_v14 = vld [vmem:[%s4590_s10] sm:$0xff] }
 0x698   :  { %v2346_v17 = vsel %vm1055_vm2, %v3902_v16, 0.0 }
 0x699   :  { %2347 = vadd.xlane.f32.xlu1 %v2346_v17  ;;  %v3010_v17 = vld [vmem:[%s4590_s10 + $0x18] sm:$0xff] }
 0x69b   :  { %2966 = vadd.xlane.f32.xlu0 %v2965_v18 }
 0x720   :  { %v2339_v41 = vpop.xlane.xlu0 %2338 }
 0x721   :  { %3903 = vrcp.f32 %v2339_v41  ;;  %v3109_v41 = vld [vmem:[%s4592_s12] sm:$0xff] }
 0x722   :  { %v2342_v45 = vpop.xlane.xlu1 %2341 }
 0x723   :  { %3905 = vrcp.f32 %v2342_v45  ;;  %v3110_v45 = vld [vmem:[%s4592_s12 + $0x8] sm:$0xff] }
 0x724   :  { %v2345_v46 = vpop.xlane.xlu0 %2344 }
 0x725   :  { %3907 = vrcp.f32 %v2345_v46  ;;  %v3111_v46 = vld [vmem:[%s4592_s12 + $0x10] sm:$0xff] }
 0x726   :  { %v2348_v49 = vpop.xlane.xlu1 %2347 }
 0x727   :  { %3909 = vrcp.f32 %v2348_v49  ;;  %v3838_v49 = vpack.c.bf16 %v3110_v45, %v3109_v41 }
 0x728   :  { %v2967_v50 = vpop.xlane.xlu0 %2966 }
 0x729   :  { %v2971_v0 = vmul.f32 0.03125, %v2967_v50  ;;  %v3112_v50 = vld [vmem:[%s4592_s12 + $0x18] sm:$0xff] }
 0x72b   :  { %v3904_v53 = vpop.eup %3903  ;;  %v2973_v57 = vsub.f32 %v4433_v15, %v2971_v0  ;;  %v3842_v0 = vpack.c.bf16 %v3112_v50, %v3111_v46 }
 0x72c   :  { %v2353_v61 = vmul.f32 %v3904_v53, %v3896_v5  ;;  %v3113_v53 = vld [vmem:[%s4592_s12 + $0x20] sm:$0xff] }
 0x72d   :  { %v3906_v42 = vpop.eup %3905  ;;  %v2975_v19 = vmul.f32 %v2973_v57, %v2973_v57 }
 0x72e   :  { %v2354_v20 = vmul.f32 %v3906_v42, %v3898_v10  ;;  %3651 = vmatmul.mubr.msk.f32.vlgmr.msra.gmra.mrb[32].mxu0 %vm1055_vm2, %v2353_v61 }
 0x72f   :  { %v3908_v54 = vpop.eup %3907  ;;  %3659 = vmatpush3.msra.mxu0 %v4295_v63  ;;  %v2977_v21 = vsel %vm52_vm0, %v2975_v19, 0.0  ;;  %3660 = vmatprep.mubr.msk.f32.mxu0 %vm3944_vm1, %v3943_v40 }
 0x730   :  { %v2355_v22 = vmul.f32 %v3908_v54, %v3900_v13  ;;  %3656 = vmatmul.mubr.msk.f32.vlgmr.msra.gmra.mrb[24].mxu1 %vm1055_vm2, %v2354_v20  ;;  %2978 = vadd.xlane.f32.xlu0 %v2977_v21 }
 0x731   :  { %v3910_v23 = vpop.eup %3909  ;;  %3664 = vmatpush3.msra.mxu1 %v4280_v58  ;;  %3665 = vmatprep.mubr.msk.f32.mxu1 %vm3944_vm1, %v3943_v40 }
 0x732   :  { %v2356_v24 = vmul.f32 %v3910_v23, %v3902_v16  ;;  %3661 = vmatmul.mubr.msk.f32.vlgmr.msra.gmra.mrb[34].mxu0 %vm1055_vm2, %v2355_v22  ;;  %3668 = vmatprep.subr.mxu0 %v3943_v40  ;;  %v3009_v16 = vld [vmem:[%s4590_s10 + $0x10] sm:$0xff] }
 0x733   :  { %3669 = vmatpush3.msra.mxu0 %v4338_v60  ;;  %3673 = vmatprep.subr.mxu1 %v3943_v40  ;;  %v3834_v18 = vpack.c.bf16 %v3010_v17, %v3009_v16 }
 0x734   :  { %3666 = vmatmul.mubr.msk.f32.vlgmr.msra.gmra.mrb[26].mxu1 %vm1055_vm2, %v2356_v24  ;;  %3670 = vmatprep.mubr.msk.f32.mxu0 %vm3944_vm1, %v3943_v40  ;;  %v3115_v24 = vld [vmem:[%s4592_s12 + $0x30] sm:$0xff] }
 0x735   :  { %3674 = vmatpush3.msra.mxu1 %v4344_v2  ;;  %3678 = vmatprep.subr.mxu0 %v3943_v40 }
 0x736   :  { %3675 = vmatprep.mubr.msk.f32.mxu1 %vm3944_vm1, %v3943_v40  ;;  %3683 = vmatprep.subr.mxu1 %v3943_v40 }
 0x7bd   :  { %v2979_v58 = vpop.xlane.xlu0 %2978 }
 0x7be   :  { %v2983_v63 = vmul.f32 0.03125, %v2979_v58  ;;  %v3116_v58 = vld [vmem:[%s4592_s12 + $0x38] sm:$0xff] }
 0x7c0   :  { %v2985_v25 = vadd.f32 1e-05, %v2983_v63  ;;  %v3850_v63 = vpack.c.bf16 %v3116_v58, %v3115_v24 }
 0x7c2   :  { %3911 = vrsqrt.f32 %v2985_v25  ;;  %v3117_v25 = vld [vmem:[%s4592_s12 + $0x40] sm:$0xff] }
 0x7cc   :  { %v3912_v60 = vpop.eup %3911 }
 0x7cd   :  { %v2989_v26 = vmul.f32 %v3912_v60, %v2973_v57  ;;  %v3114_v57 = vld [vmem:[%s4592_s12 + $0x28] sm:$0xff] }
 0x7ce   :  { %v3846_v61 = vpack.c.bf16 %v3114_v57, %v3113_v53  ;;  %v3118_v60 = vld [vmem:[%s4592_s12 + $0x48] sm:$0xff] }
 0x7cf   :  { %v2997_v2 = vmul.f32 %v4463_v27, %v2989_v26  ;;  %v3854_v26 = vpack.c.bf16 %v3118_v60, %v3117_v25 }
 0x7d1   :  { %v3005_v34 = vadd.f32 %v4470_v30, %v2997_v2 }
 0x801   :  { %v2426_v28 = vpop.f32.mrb[32].mxu0 }
 0x802   :  { %v3652_v29 = vpop.f32.mrb[33].mxu0  ;;  %3671 = vmatmul.mubr.msk.f32.vlgmr.msra.gmra.mrb[36].mxu0 %vm1055_vm2, %v2426_v28  ;;  %v3120_v28 = vld [vmem:[%s4592_s12 + $0x58] sm:$0xff] }
 0x803   :  { %v2499_v31 = vpop.f32.mrb[24].mxu1  ;;  %3679 = vmatpush3.msra.mxu0 %v4352_v9  ;;  %3680 = vmatprep.mubr.msk.f32.mxu0 %vm3944_vm1, %v3943_v40  ;;  %v3121_v29 = vld [vmem:[%s4592_s12 + $0x60] sm:$0xff] }
 0x804   :  { %v3657_v32 = vpop.f32.mrb[25].mxu1  ;;  %3676 = vmatmul.mubr.msk.f32.vlgmr.msra.gmra.mrb[28].mxu1 %vm1055_vm2, %v2499_v31 }
 0x805   :  { %v2572_v33 = vpop.f32.mrb[34].mxu0  ;;  %3684 = vmatpush3.msra.mxu1 %v4361_v12  ;;  %3685 = vmatprep.mubr.msk.f32.mxu1 %vm3944_vm1, %v3943_v40  ;;  %v3123_v32 = vld [vmem:[%s4592_s12 + $0x70] sm:$0xff] }
 0x806   :  { %v3662_v35 = vpop.f32.mrb[35].mxu0  ;;  %3681 = vmatmul.mubr.msk.f32.vlgmr.msra.gmra.mrb[38].mxu0 %vm1055_vm2, %v2572_v33  ;;  %3839 = vmatprep.subr.bf16.mxu1 %v3838_v49  ;;  %v3124_v33 = vld [vmem:[%s4592_s12 + $0x78] sm:$0xff] }
 0x807   :  { %v2645_v36 = vpop.f32.mrb[26].mxu1  ;;  %3696 = vmatprep.mubr.msk.f32.mxu0 %vm52_vm0, %v3005_v34  ;;  %v3866_v34 = vpack.c.bf16 %v3124_v33, %v3123_v32  ;;  %v3288_v35 = vld [vmem:[%s4591_s11] ss:$0 sm:$0xff] }
 0x808   :  { %v3667_v9 = vpop.f32.mrb[27].mxu1  ;;  %3686 = vmatmul.mubr.msk.f32.vlgmr.msra.gmra.mrb[30].mxu1 %vm1055_vm2, %v2645_v36 }
 0x809   :  { %3841 = vmatpush3.bf16.msra.mxu1 %v3838_v49 }
 0x80a   :  { %3843 = vmatprep.subr.bf16.mxu1 %v3842_v0 }
 0x80d   :  { %3845 = vmatpush3.bf16.msra.mxu1 %v3842_v0 }
 0x80e   :  { %3847 = vmatprep.subr.bf16.mxu1 %v3846_v61 }
 0x811   :  { %3849 = vmatpush3.bf16.msra.mxu1 %v3846_v61 }
 0x812   :  { %3851 = vmatprep.subr.bf16.mxu1 %v3850_v63 }
 0x815   :  { %3853 = vmatpush3.bf16.msra.mxu1 %v3850_v63 }
 0x816   :  { %3855 = vmatprep.subr.bf16.mxu1 %v3854_v26 }
 0x819   :  { %3857 = vmatpush3.bf16.msra.mxu1 %v3854_v26 }
 0x8d5   :  { %v2722_v37 = vpop.f32.mrb[36].mxu0 }
 0x8d6   :  { %v3672_v38 = vpop.f32.mrb[37].mxu0  ;;  %v2945_v43 = vsel %vm52_vm0, %v2722_v37, 0.0 }
 0x8d7   :  { %v2795_v39 = vpop.f32.mrb[28].mxu1 }
 0x8d8   :  { %v2946_v12 = vsel %vm52_vm0, %v2795_v39, 0.0  ;;  %v3677_v44 = vpop.f32.mrb[29].mxu1 }
 0x8d9   :  { %v2947_v40 = vadd.f32 %v2946_v12, %v2945_v43  ;;  %v2868_v47 = vpop.f32.mrb[38].mxu0 }
 0x8da   :  { %v2948_v48 = vsel %vm52_vm0, %v2868_v47, 0.0  ;;  %v3682_v51 = vpop.f32.mrb[39].mxu0 }
 0x8db   :  { %v2949_v52 = vadd.f32 %v2948_v48, %v2947_v40  ;;  %v2941_v55 = vpop.f32.mrb[30].mxu1 }
 0x8dc   :  { %v2950_v56 = vsel %vm52_vm0, %v2941_v55, 0.0  ;;  %v3687_v59 = vpop.f32.mrb[31].mxu1 }
 0x8dd   :  { %v2951_v62 = vadd.f32 %v2950_v56, %v2949_v52  ;;  %v3291_v56 = vld [vmem:[%s4593_s13] ss:$0 sm:$0xff] }
 0x8df   :  { %v2960_v3 = vadd.f32 %v4426_v4, %v2951_v62 }
 0x8e1   :  { %v4489_v8 = vadd.f32 %v2960_v3, %v4031_v1  ;;  %v3008_v1 = vld [vmem:[%s4590_s10 + $0x8] sm:$0xff]  ;;  %s3216_s10 = sshll.u32 %s3945_s21, 4  ;;  %s3217_s10 = int_to_ptr.vmem [resolvable:$true] %s3216_s10 }
 0x8e2   :  { %v3830_v4 = vpack.c.bf16 %v3008_v1, %v3007_v14  ;;  %s3919_s22 = scalar_lea.vmem %s3217_s10, 256  ;;  %p3924_p1 = scmp.lt.s32.totalorder %s3217_s10, %s3217_s10 }
 0x8e3   :  { %v2968_v5 = vsel %vm52_vm0, %v4489_v8, 0.0  ;;  %p3920_p0 = scmp.ne.s32.totalorder %s3217_s10, %s3919_s22  ;;  %p3925_p2 = scmp.lt.s32.totalorder %s3919_s22, %s3919_s22 }
 0x8e4   :  { %2969 = vadd.xlane.f32.xlu1 %v2968_v5  ;;  %3831 = vmatprep.subr.bf16.mxu0 %v3830_v4 }
 0x8e5   :  { %3833 = vmatpush3.bf16.msra.mxu0 %v3830_v4  ;;  %p3926_p3 = por %p3925_p2, %p3924_p1 }
 0x8e6   :  { %3835 = vmatprep.subr.bf16.mxu0 %v3834_v18 }
 0x8e7   :  { %p3927_p4 = pnand %p3926_p3, %p3920_p0 }
 0x8e9   :  { %3837 = vmatpush3.bf16.msra.mxu0 %v3834_v18 }
 0x971   :  { %v2970_v6 = vpop.xlane.xlu1 %2969 }
 0x972   :  { %v2972_v7 = vmul.f32 0.03125, %v2970_v6 }
 0x974   :  { %v2974_v10 = vsub.f32 %v4489_v8, %v2972_v7 }
 0x976   :  { %v2976_v11 = vmul.f32 %v2974_v10, %v2974_v10 }
 0x978   :  { %v2980_v13 = vsel %vm52_vm0, %v2976_v11, 0.0 }
 0x979   :  { %2981 = vadd.xlane.f32.xlu1 %v2980_v13 }
 0xa06   :  { %v2982_v42 = vpop.xlane.xlu1 %2981 }
 0xa07   :  { %v2984_v19 = vmul.f32 0.03125, %v2982_v42 }
 0xa09   :  { %v2986_v20 = vadd.f32 1e-05, %v2984_v19 }
 0xa0b   :  { %3913 = vrsqrt.f32 %v2986_v20 }
 0xa15   :  { %v3914_v54 = vpop.eup %3913 }
 0xa16   :  { %v2990_v21 = vmul.f32 %v3914_v54, %v2974_v10 }
 0xa18   :  { %v2998_v22 = vmul.f32 %v4463_v27, %v2990_v21  ;;  %v3119_v27 = vld [vmem:[%s4592_s12 + $0x50] sm:$0xff] }
 0xa19   :  { %v3858_v2 = vpack.c.bf16 %v3120_v28, %v3119_v27 }
 0xa1a   :  { %v3006_v23 = vadd.f32 %v4470_v30, %v2998_v22  ;;  %v3122_v30 = vld [vmem:[%s4592_s12 + $0x68] sm:$0xff] }
 0xa1b   :  { %3859 = vmatprep.subr.bf16.mxu1 %v3858_v2  ;;  %v3862_v31 = vpack.c.bf16 %v3122_v30, %v3121_v29 }
 0xa1c   :  { %3697 = vmatmul.mubr.msk.f32.vlgmr.msra.gmra.mrb[40].mxu0 %vm52_vm0, %v3006_v23  ;;  %3861 = vmatpush3.bf16.msra.mxu1 %v3858_v2 }
 0xa1d   :  { %3863 = vmatprep.subr.bf16.mxu1 %v3862_v31 }
 0xa20   :  { %3865 = vmatpush3.bf16.msra.mxu1 %v3862_v31 }
 0xa21   :  { %3867 = vmatprep.subr.bf16.mxu1 %v3866_v34 }
 0xa24   :  { %3869 = vmatpush3.bf16.msra.mxu1 %v3866_v34 }
 0xaef   :  { %v3698_v36 = vpop.f32.mrb[40].mxu0 }
 0xaf0   :  { %v3096_v9 = vadd.f32 %v3698_v36, %v3288_v35  ;;  %v3090_v37 = vpop.f32.mrb[41].mxu0 }
 0xaf1   :  { %v3091_v38 = vadd.f32 %v3288_v35, %v3090_v37 }
 0xaf2   :  { %v3102_v39 = vmul.f32 0.70710677, %v3096_v9  ;;  %v3100_v51 = vmul.f32 0.5, %v3096_v9 }
 0xaf3   :  { %v3101_v43 = vmul.f32 0.70710677, %v3091_v38  ;;  %v3099_v47 = vmul.f32 0.5, %v3091_v38 }
 0xaf4   :  { %3915 = verf.f32 %v3102_v39 }
 0xaf5   :  { %3917 = verf.f32 %v3101_v43 }
 0xafe   :  { %v3916_v12 = vpop.eup %3915 }
 0xaff   :  { %v3918_v44 = vpop.eup %3917  ;;  %v3106_v40 = vadd.f32 1.0, %v3916_v12 }
 0xb00   :  { %v3105_v48 = vadd.f32 1.0, %v3918_v44 }
 0xb01   :  { %v3108_v55 = vmul.f32 %v3106_v40, %v3100_v51 }
 0xb02   :  { %v3107_v52 = vmul.f32 %v3105_v48, %v3099_v47 }
 0xb04   :  { %3731 = vmatprep.mubr.f32.mxu1 %v3107_v52 }
 0xb05   :  { %3732 = vmatmul.mubr.f32.vlgmr.msra.gmra.mrb[32].mxu1 %v3108_v55 }
 0xbd8   :  { %v3733_v59 = vpop.f32.mrb[32].mxu1 }
 0xbd9   :  { %v3204_v62 = vadd.f32 %v3733_v59, %v3291_v56  ;;  %v3198_v3 = vpop.f32.mrb[33].mxu1 }
 0xbda   :  { %v3199_v5 = vadd.f32 %v3291_v56, %v3198_v3 }
 0xbdb   :  { %v3208_v6 = vadd.f32 %v3204_v62, %v4489_v8 }
 0xbdc   :  { %v3207_v7 = vadd.f32 %v3199_v5, %v4433_v15 }
 0xbdd   :  { %3210 = vst.msk [vmem:[#allocation2 + $0x8] sm:$0xff] %vm52_vm0, %v3208_v6 }
 0xbde   :  { %3209 = vst.msk [vmem:[#allocation2] sm:$0xff] %vm52_vm0, %v3207_v7 }
 0xbdf   :  { %3930 = shalt.err (!%p3927_p4)
}
 0xbe0   :  { %s3931_s24 = scalar_lea.hbm %s4594_s14, 256 }
 0xbe1   :  { %p3932_p5 = scmp.ne.s32.totalorder %s4594_s14, %s3931_s24  ;;  %p3935_p6 = scmp.lt.u32.totalorder %s3931_s24, %s4594_s14 }
 0xbe3   :  { %p3937_p7 = pnand %p3935_p6, %p3932_p5 }
 0xbe5   :  { %3940 = shalt.err (!%p3937_p7)
}
 0xbe6   :  { %s3946_s27 = smov 128   ;;  %s3947_s4 = smov 8  }
 0xbe7   :  { %3222 = dma.vmem_to_hbm [thread:$0]  %s3217_s10, 256, %s4594_s14, [#allocation3], %s3946_s27, %s3946_s27, %s3947_s4  }
 0xbe8   :  { %3941 = dma.done.wait [#allocation3], 256  }
 0xbe9   :  { %3942 = vsyncadd [#allocation3], 4294967040 }
 0xbea   :  { %3226 = vsyncpa [#allocation3], 1 }

</bundles_post_ra>
